<compile_context>
chip_gen: v7x
topology: tpu7x:2x2x1
jax: 0.10.0
libtpu: 0.0.40
codegen_flags: <defaults>
</compile_context>

<pallas_src>
import functools

import jax
import jax.numpy as jnp
from jax.experimental import pallas as pl
from jax.experimental.pallas import tpu as pltpu


def _round_up(x: int, m: int) -> int:
    return ((x + m - 1) // m) * m


def _vmem_limit_bytes(headroom: int = 16 << 20, fallback: int = 64 << 20) -> int:
    """Generation-aware VMEM budget (capacity minus headroom)."""
    try:
        info = pltpu.get_tpu_info()
        cap = int(getattr(info, "vmem_capacity_bytes", fallback))
    except Exception:
        cap = fallback
    return max(32 << 20, cap - headroom)


def _resident_spec(shape):
    """Constant-index BlockSpec, single-buffered when supported."""
    index_map = lambda i: (0, 0)
    try:
        return pl.BlockSpec(shape, index_map, pipeline_mode=pl.Buffered(1)), 1
    except TypeError:  # older jax without pipeline_mode: fall back to default
        return pl.BlockSpec(shape, index_map), 2


def _pick_tile(dim: int, prefs=(512, 256, 128)) -> int:
    for p in prefs:
        if dim % p == 0:
            return p
    return dim


# ---------------------------------------------------------------------------
# Fused kernel: whole MLP per batch row tile, all weights resident in VMEM.
# ---------------------------------------------------------------------------
def _mlp_kernel(*refs, num_layers: int, compute_dtype):
    """refs = (x_ref, w0, b0, ..., w_{L-1}, b_{L-1}, o_ref)."""
    x_ref = refs[0]
    o_ref = refs[-1]
    wb = refs[1:-1]

    h = x_ref[...]  # (tm, D0) compute_dtype
    for i in range(num_layers):
        w_ref = wb[2 * i]
        b_ref = wb[2 * i + 1]
        y = jnp.dot(h, w_ref[...], preferred_element_type=jnp.float32)
        y = y + b_ref[...]  # f32 bias, broadcast over rows
        if i < num_layers - 1:
            # cast to compute dtype before ReLU (cheaper VPU pass / bf16 act)
            h = jnp.maximum(y.astype(compute_dtype), 0)
        else:
            o_ref[...] = y.astype(o_ref.dtype)


# ---------------------------------------------------------------------------
# Streaming fallback: one tiled matmul+bias(+ReLU) pallas_call per layer.
# ---------------------------------------------------------------------------
def _layer_kernel(x_ref, w_ref, b_ref, o_ref, acc_ref, *, apply_relu: bool):
    k = pl.program_id(2)

    @pl.when(k == 0)
    def _init():
        acc_ref[...] = jnp.zeros_like(acc_ref)

    acc_ref[...] += jnp.dot(x_ref[...], w_ref[...],
                            preferred_element_type=jnp.float32)

    @pl.when(k == pl.num_programs(2) - 1)
    def _fin():
        y = acc_ref[...] + b_ref[...]
        if apply_relu:
            y = jnp.maximum(y, 0.0)
        o_ref[...] = y.astype(o_ref.dtype)


def _stream_layer(h, w_p, b_p, *, apply_relu, out_dtype, tm, vmem_limit):
    M, K = h.shape
    N = w_p.shape[1]
    tn = _pick_tile(N)
    tk = _pick_tile(K)
    grid = (M // tm, N // tn, K // tk)
    kernel = functools.partial(_layer_kernel, apply_relu=apply_relu)
    return pl.pallas_call(
        kernel,
        out_shape=jax.ShapeDtypeStruct((M, N), out_dtype),
        grid=grid,
        in_specs=[pl.BlockSpec((tm, tk), lambda i, j, k: (i, k)),
                  pl.BlockSpec((tk, tn), lambda i, j, k: (k, j)),
                  pl.BlockSpec((1, tn), lambda i, j, k: (0, j))],
        out_specs=pl.BlockSpec((tm, tn), lambda i, j, k: (i, j)),
        scratch_shapes=[pltpu.VMEM((tm, tn), jnp.float32)],
        compiler_params=pltpu.CompilerParams(
            dimension_semantics=("parallel", "parallel", "arbitrary"),
            vmem_limit_bytes=vmem_limit),
    )(h, w_p, b_p)


# ---------------------------------------------------------------------------
# Param preparation (hoisted out of the traced hot path).
# ---------------------------------------------------------------------------
def prepare_mlp_params(params, *, compute_dtype=jnp.bfloat16, lane: int = 128):
    """Pad (to lane multiples) and cast weights once; returns (padded, dims)."""
    dims = [params[0][0].shape[0]] + [w.shape[1] for (w, _) in params]
    pdims = [_round_up(d, lane) for d in dims]
    padded = []
    for li, (w, b) in enumerate(params):
        din, dout = w.shape
        w_p = jnp.zeros((pdims[li], pdims[li + 1]), compute_dtype)
        w_p = w_p.at[:din, :dout].set(w.astype(compute_dtype))
        b_p = jnp.zeros((1, pdims[li + 1]), jnp.float32)
        b_p = b_p.at[0, :dout].set(b.astype(jnp.float32))
        padded.append((w_p, b_p))
    return padded, tuple(dims)


# ---------------------------------------------------------------------------
# Forward pass.
# ---------------------------------------------------------------------------
def mlp_forward(prepared, x, *, dims, tm: int = 512,
                compute_dtype=jnp.bfloat16, out_dtype=jnp.float32,
                force_stream: bool = False):
    """(Linear+ReLU)^(L-1) -> Linear. prepared = prepare_mlp_params(params)[0]."""
    B, D_in = x.shape
    assert D_in == dims[0], "x feature dim does not match params"
    num_layers = len(prepared)
    pdims = [prepared[0][0].shape[0]] + [w.shape[1] for (w, _) in prepared]

    elt = jnp.dtype(compute_dtype).itemsize
    out_isz = jnp.dtype(out_dtype).itemsize
    vmem_limit = _vmem_limit_bytes()

    # --- resident-weight footprint (single-buffered if Buffered(1) works) ---
    wb_specs = []
    buf_factor = 1
    for (w_p, b_p) in prepared:
        ws, bf = _resident_spec(w_p.shape)
        bs, _ = _resident_spec(b_p.shape)
        buf_factor = max(buf_factor, bf)
        wb_specs += [ws, bs]
    resident_bytes = buf_factor * sum(w.size * elt + b.size * 4
                                      for (w, b) in prepared)

    per_row = (2 * pdims[0] * elt          # x tile, double-buffered
               + 2 * pdims[-1] * out_isz   # out tile, double-buffered
               + 3 * max(pdims) * 4)       # intermediate activations (f32)
    margin = 4 << 20
    fused_ok = (not force_stream) and (
        resident_bytes + 16 * per_row + margin <= vmem_limit)

    # --- batch tile selection --------------------------------------------
    if fused_ok:
        tm_budget = (vmem_limit - resident_bytes - margin) // per_row
        tm = min(tm, int(tm_budget))
    tm = max(16, (tm // 16) * 16)
    tm = min(tm, _round_up(B, 16))
    if B >= 32:
        # keep >= 2 grid steps so both v7x TensorCores get work
        tm = min(tm, _round_up((B + 1) // 2, 16))
    tm = max(16, tm)
    Bp = _round_up(B, tm)

    # --- pad / cast x (skipped when already aligned) -----------------------
    if Bp == B and pdims[0] == D_in:
        x_p = x.astype(compute_dtype)
    else:
        x_p = jnp.zeros((Bp, pdims[0]), compute_dtype)
        x_p = x_p.at[:B, :D_in].set(x.astype(compute_dtype))

    if fused_ok:
        in_specs = [pl.BlockSpec((tm, pdims[0]), lambda i: (i, 0))] + wb_specs
        flat_inputs = [x_p]
        for (w_p, b_p) in prepared:
            flat_inputs += [w_p, b_p]
        out_specs = pl.BlockSpec((tm, pdims[-1]), lambda i: (i, 0))

        flops = 2 * Bp * sum(pdims[i] * pdims[i + 1] for i in range(num_layers))
        bytes_accessed = (x_p.size * elt + resident_bytes
                          + Bp * pdims[-1] * out_isz)
        cost = pl.CostEstimate(flops=flops, transcendentals=0,
                               bytes_accessed=bytes_accessed)

        kernel = functools.partial(_mlp_kernel, num_layers=num_layers,
                                   compute_dtype=compute_dtype)
        out_p = pl.pallas_call(
            kernel,
            out_shape=jax.ShapeDtypeStruct((Bp, pdims[-1]), out_dtype),
            grid=(Bp // tm,),
            in_specs=in_specs,
            out_specs=out_specs,
            compiler_params=pltpu.CompilerParams(
                dimension_semantics=("parallel",),
                vmem_limit_bytes=vmem_limit),
            cost_estimate=cost,
        )(*flat_inputs)
    else:
        # Streaming fallback: layer-by-layer tiled matmul+bias(+ReLU).
        h = x_p
        for i, (w_p, b_p) in enumerate(prepared):
            last = (i == num_layers - 1)
            h = _stream_layer(h, w_p, b_p,
                              apply_relu=not last,
                              out_dtype=out_dtype if last else compute_dtype,
                              tm=tm, vmem_limit=vmem_limit)
        out_p = h

    if Bp == B and pdims[-1] == dims[-1]:
        return out_p
    return out_p[:B, :dims[-1]]


# ---------------------------------------------------------------------------
# Init + pure-JAX reference.
# ---------------------------------------------------------------------------
def init_mlp_params(key, input_dim, hidden_dim, output_dim, layer_nums):
    """Mirrors nn.Linear's U(-1/sqrt(fan_in), 1/sqrt(fan_in)) init."""
    shapes = []
    in_dim = input_dim
    for _ in range(layer_nums - 1):
        shapes.append((in_dim, hidden_dim))
        in_dim = hidden_dim
    shapes.append((in_dim, output_dim))

    params = []
    for (din, dout) in shapes:
        key, kw, kb = jax.random.split(key, 3)
        bound = 1.0 / jnp.sqrt(jnp.float32(din))
        w = jax.random.uniform(kw, (din, dout), jnp.float32, -bound, bound)
        b = jax.random.uniform(kb, (dout,), jnp.float32, -bound, bound)
        params.append((w, b))
    return params


def mlp_forward_ref(params, x):
    """Pure-JAX f32 reference: Sequential[Linear+ReLU]*(L-1) then Linear."""
    h = x
    n = len(params)
    for i, (w, b) in enumerate(params):
        h = h @ w + b
        if i < n - 1:
            h = jnp.maximum(h, 0.0)
    return h


if __name__ == "__main__":
    key = jax.random.PRNGKey(0)
    kx, kp = jax.random.split(key)

    batch = 8
    input_dim = 32
    hidden_dim = 32
    output_dim = 16
    layer_nums = 3

    x = jax.random.normal(kx, (batch, input_dim), jnp.float32)
    params = init_mlp_params(kp, input_dim, hidden_dim, output_dim, layer_nums)

    # Pad + cast weights once, outside the traced forward path.
    prepared, dims = prepare_mlp_params(params)
    ref = mlp_forward_ref(params, x)

    # Fused (weights-resident) path.
    fwd = jax.jit(functools.partial(mlp_forward, dims=dims))
    out = jax.block_until_ready(fwd(prepared, x))
    assert out.shape == (batch, output_dim)
    assert jnp.allclose(out, ref, atol=5e-2, rtol=5e-2), float(
        jnp.max(jnp.abs(out - ref)))

    # Streaming fallback path (exercised explicitly for correctness).
    fwd_stream = jax.jit(functools.partial(mlp_forward, dims=dims,
                                           force_stream=True))
    out2 = jax.block_until_ready(fwd_stream(prepared, x))
    assert out2.shape == (batch, output_dim)
    assert jnp.allclose(out2, ref, atol=5e-2, rtol=5e-2), float(
        jnp.max(jnp.abs(out2 - ref)))

    print("KERNEL_OK")
</pallas_src>

<mosaic_0001>
module attributes {stable_mosaic.version = 11 : i64} {
  func.func @_mlp_kernel(%arg0: i32, %arg1: memref<16x128xbf16, #tpu.memory_space<vmem>>, %arg2: memref<128x128xbf16, #tpu.memory_space<vmem>>, %arg3: memref<1x128xf32, #tpu.memory_space<vmem>>, %arg4: memref<128x128xbf16, #tpu.memory_space<vmem>>, %arg5: memref<1x128xf32, #tpu.memory_space<vmem>>, %arg6: memref<128x128xbf16, #tpu.memory_space<vmem>>, %arg7: memref<1x128xf32, #tpu.memory_space<vmem>>, %arg8: memref<16x128xf32, #tpu.memory_space<vmem>>) attributes {dimension_semantics = [#tpu.dimension_semantics<parallel>], iteration_bounds = array<i64: 1>, scalar_prefetch = 0 : i64, scratch_operands = 0 : i64, tpu.core_type = #tpu.core_type<tc>, window_params = [{transform_indices = @transform_0, window_bounds = array<i64: 16, 128>}, {pipeline_mode = #tpu.pipeline_mode<synchronous>, transform_indices = @transform_1, window_bounds = array<i64: 128, 128>}, {pipeline_mode = #tpu.pipeline_mode<synchronous>, transform_indices = @transform_2, window_bounds = array<i64: 1, 128>}, {pipeline_mode = #tpu.pipeline_mode<synchronous>, transform_indices = @transform_3, window_bounds = array<i64: 128, 128>}, {pipeline_mode = #tpu.pipeline_mode<synchronous>, transform_indices = @transform_4, window_bounds = array<i64: 1, 128>}, {pipeline_mode = #tpu.pipeline_mode<synchronous>, transform_indices = @transform_5, window_bounds = array<i64: 128, 128>}, {pipeline_mode = #tpu.pipeline_mode<synchronous>, transform_indices = @transform_6, window_bounds = array<i64: 1, 128>}, {transform_indices = @transform_7, window_bounds = array<i64: 16, 128>}]} {
    %c0 = arith.constant 0 : index
    %c0_0 = arith.constant 0 : index
    %0 = vector.load %arg1[%c0, %c0_0] : memref<16x128xbf16, #tpu.memory_space<vmem>>, vector<16x128xbf16>
    %c0_1 = arith.constant 0 : index
    %c0_2 = arith.constant 0 : index
    %1 = vector.load %arg2[%c0_1, %c0_2] : memref<128x128xbf16, #tpu.memory_space<vmem>>, vector<128x128xbf16>
    %cst = arith.constant dense<0.000000e+00> : vector<16x128xf32>
    %2 = tpu.matmul %0, %1, %cst {dimension_numbers = #tpu.dot_dimension_numbers<[1], [0], [0], [1], [0, 0, 1, 1], [], []>} : vector<16x128xbf16>, vector<128x128xbf16>, vector<16x128xf32> -> vector<16x128xf32>
    %c0_3 = arith.constant 0 : index
    %c0_4 = arith.constant 0 : index
    %3 = vector.load %arg3[%c0_3, %c0_4] : memref<1x128xf32, #tpu.memory_space<vmem>>, vector<1x128xf32>
    %4 = vector.broadcast %3 : vector<1x128xf32> to vector<16x128xf32>
    %5 = arith.addf %2, %4 : vector<16x128xf32>
    %6 = arith.truncf %5 : vector<16x128xf32> to vector<16x128xbf16>
    %cst_5 = arith.constant 0.000000e+00 : bf16
    %7 = vector.broadcast %cst_5 : bf16 to vector<16x128xbf16>
    %8 = arith.maximumf %6, %7 : vector<16x128xbf16>
    %c0_6 = arith.constant 0 : index
    %c0_7 = arith.constant 0 : index
    %9 = vector.load %arg4[%c0_6, %c0_7] : memref<128x128xbf16, #tpu.memory_space<vmem>>, vector<128x128xbf16>
    %cst_8 = arith.constant dense<0.000000e+00> : vector<16x128xf32>
    %10 = tpu.matmul %8, %9, %cst_8 {dimension_numbers = #tpu.dot_dimension_numbers<[1], [0], [0], [1], [0, 0, 1, 1], [], []>} : vector<16x128xbf16>, vector<128x128xbf16>, vector<16x128xf32> -> vector<16x128xf32>
    %c0_9 = arith.constant 0 : index
    %c0_10 = arith.constant 0 : index
    %11 = vector.load %arg5[%c0_9, %c0_10] : memref<1x128xf32, #tpu.memory_space<vmem>>, vector<1x128xf32>
    %12 = vector.broadcast %11 : vector<1x128xf32> to vector<16x128xf32>
    %13 = arith.addf %10, %12 : vector<16x128xf32>
    %14 = arith.truncf %13 : vector<16x128xf32> to vector<16x128xbf16>
    %cst_11 = arith.constant 0.000000e+00 : bf16
    %15 = vector.broadcast %cst_11 : bf16 to vector<16x128xbf16>
    %16 = arith.maximumf %14, %15 : vector<16x128xbf16>
    %c0_12 = arith.constant 0 : index
    %c0_13 = arith.constant 0 : index
    %17 = vector.load %arg6[%c0_12, %c0_13] : memref<128x128xbf16, #tpu.memory_space<vmem>>, vector<128x128xbf16>
    %cst_14 = arith.constant dense<0.000000e+00> : vector<16x128xf32>
    %18 = tpu.matmul %16, %17, %cst_14 {dimension_numbers = #tpu.dot_dimension_numbers<[1], [0], [0], [1], [0, 0, 1, 1], [], []>} : vector<16x128xbf16>, vector<128x128xbf16>, vector<16x128xf32> -> vector<16x128xf32>
    %c0_15 = arith.constant 0 : index
    %c0_16 = arith.constant 0 : index
    %19 = vector.load %arg7[%c0_15, %c0_16] : memref<1x128xf32, #tpu.memory_space<vmem>>, vector<1x128xf32>
    %20 = vector.broadcast %19 : vector<1x128xf32> to vector<16x128xf32>
    %21 = arith.addf %18, %20 : vector<16x128xf32>
    %c0_17 = arith.constant 0 : index
    %c0_18 = arith.constant 0 : index
    %22 = vector.load %arg8[%c0_17, %c0_18] : memref<16x128xf32, #tpu.memory_space<vmem>>, vector<16x128xf32>
    tpu.vector_store %arg8[%c0_17, %c0_18], %21 {strides = array<i32>} : memref<16x128xf32, #tpu.memory_space<vmem>>, vector<16x128xf32>,
    return
  }
  func.func @transform_0(%arg0: i32) -> (i32, i32) {
    %c0_i32 = arith.constant 0 : i32
    %c0_i32_0 = arith.constant 0 : i32
    return %arg0, %c0_i32 : i32, i32
  }
  func.func @transform_1(%arg0: i32) -> (i32, i32) {
    %c0_i32 = arith.constant 0 : i32
    %c0_i32_0 = arith.constant 0 : i32
    %c0_i32_1 = arith.constant 0 : i32
    return %c0_i32, %c0_i32_0 : i32, i32
  }
  func.func @transform_2(%arg0: i32) -> (i32, i32) {
    %c0_i32 = arith.constant 0 : i32
    %c0_i32_0 = arith.constant 0 : i32
    %c0_i32_1 = arith.constant 0 : i32
    return %c0_i32, %c0_i32_0 : i32, i32
  }
  func.func @transform_3(%arg0: i32) -> (i32, i32) {
    %c0_i32 = arith.constant 0 : i32
    %c0_i32_0 = arith.constant 0 : i32
    %c0_i32_1 = arith.constant 0 : i32
    return %c0_i32, %c0_i32_0 : i32, i32
  }
  func.func @transform_4(%arg0: i32) -> (i32, i32) {
    %c0_i32 = arith.constant 0 : i32
    %c0_i32_0 = arith.constant 0 : i32
    %c0_i32_1 = arith.constant 0 : i32
    return %c0_i32, %c0_i32_0 : i32, i32
  }
  func.func @transform_5(%arg0: i32) -> (i32, i32) {
    %c0_i32 = arith.constant 0 : i32
    %c0_i32_0 = arith.constant 0 : i32
    %c0_i32_1 = arith.constant 0 : i32
    return %c0_i32, %c0_i32_0 : i32, i32
  }
  func.func @transform_6(%arg0: i32) -> (i32, i32) {
    %c0_i32 = arith.constant 0 : i32
    %c0_i32_0 = arith.constant 0 : i32
    %c0_i32_1 = arith.constant 0 : i32
    return %c0_i32, %c0_i32_0 : i32, i32
  }
  func.func @transform_7(%arg0: i32) -> (i32, i32) {
    %c0_i32 = arith.constant 0 : i32
    %c0_i32_0 = arith.constant 0 : i32
    return %arg0, %c0_i32 : i32, i32
  }
}

</mosaic_0001>

<bundles_post_ra>
// kernel: mlp_forward.1
= control target key start
LH: loop header
LB: loop body
LE: loop exit
PB: predicated region body
PF: predicated region fallthrough
CT: control target
= control target key end

     0   :  { %12 = vsyncpa [#allocation3], 0  ;;  %s790_s0 = inlined_call_operand.vmem [shape: bf16[16,128], index: 0, kind: input, shape index: {}]   ;;  %s791_s1 = inlined_call_operand.hbm [shape: bf16[128,128], index: 1, kind: input, shape index: {}]   ;;  %s792_s2 = inlined_call_operand.vmem [shape: f32[1,128], index: 2, kind: input, shape index: {}]   ;;  %s793_s3 = inlined_call_operand.hbm [shape: bf16[128,128], index: 3, kind: input, shape index: {}]   ;;  %s794_s4 = inlined_call_operand.vmem [shape: f32[1,128], index: 4, kind: input, shape index: {}]   ;;  %s795_s5 = inlined_call_operand.hbm [shape: bf16[128,128], index: 5, kind: input, shape index: {}]   ;;  %s796_s6 = inlined_call_operand.vmem [shape: f32[1,128], index: 6, kind: input, shape index: {}]   ;;  %s797_s7 = inlined_call_operand.vmem [shape: f32[16,128], index: 7, kind: output, shape index: {}]  }
   0x1   :  { %13 = vsyncpa [#allocation5], 0  ;;  %s642_s24 = smov [#allocation4]   ;;  %s643_s26 = smov [#allocation2]  }
   0x2   :  { %s35_s25 = sshll.u32 %s642_s24, 4  ;;  %s21_s27 = sshll.u32 %s643_s26, 4  ;;  %s36_s25 = int_to_ptr.vmem [resolvable:$true] %s35_s25  ;;  %s690_s27 = int_to_ptr.vmem [resolvable:$true] %s21_s27 }
   0x3   :  { %s572_s30 = scalar_lea.hbm %s793_s3, 1024 }
   0x4   :  { %p573_p0 = scmp.ne.s32.totalorder %s793_s3, %s572_s30  ;;  %p576_p1 = scmp.lt.u32.totalorder %s572_s30, %s793_s3 }
   0x6   :  { %p578_p2 = pnand %p576_p1, %p573_p0 }
   0x8   :  { %581 = shalt.err (!%p578_p2)
}
   0x9   :  { %s582_s12 = scalar_lea.vmem %s36_s25, 1024  ;;  %p587_p4 = scmp.lt.s32.totalorder %s36_s25, %s36_s25 }
   0xa   :  { %p583_p3 = scmp.ne.s32.totalorder %s36_s25, %s582_s12  ;;  %p588_p5 = scmp.lt.s32.totalorder %s582_s12, %s582_s12 }
   0xc   :  { %p589_p6 = por %p588_p5, %p587_p4 }
   0xe   :  { %p590_p7 = pnand %p589_p6, %p583_p3 }
  0x10   :  { %593 = shalt.err (!%p590_p7)
}
  0x11   :  { %s644_s13 = smov 64   ;;  %s645_s14 = smov 4  }
  0x12   :  { %41 = dma.hbm_to_vmem [thread:$0]  %s793_s3, 1024, %s36_s25, [#allocation5], %s644_s13, %s644_s13, %s645_s14  }
  0x13   :  { %s594_s19 = scalar_lea.hbm %s791_s1, 1024 }
  0x14   :  { %p595_p8 = scmp.ne.s32.totalorder %s791_s1, %s594_s19  ;;  %p598_p9 = scmp.lt.u32.totalorder %s594_s19, %s791_s1 }
  0x16   :  { %p600_p10 = pnand %p598_p9, %p595_p8 }
  0x18   :  { %603 = shalt.err (!%p600_p10)
}
  0x19   :  { %s604_s24 = scalar_lea.vmem %s690_s27, 1024  ;;  %p609_p12 = scmp.lt.s32.totalorder %s690_s27, %s690_s27 }
  0x1a   :  { %p605_p11 = scmp.ne.s32.totalorder %s690_s27, %s604_s24  ;;  %p610_p13 = scmp.lt.s32.totalorder %s604_s24, %s604_s24 }
  0x1c   :  { %p611_p0 = por %p610_p13, %p609_p12 }
  0x1e   :  { %p612_p1 = pnand %p611_p0, %p605_p11 }
  0x20   :  { %615 = shalt.err (!%p612_p1)
}
  0x21   :  { %27 = dma.hbm_to_vmem [thread:$0]  %s791_s1, 1024, %s690_s27, [#allocation3], %s644_s13, %s644_s13, %s645_s14  }
  0x22   :  { %s646_s26 = smov [#allocation6]   ;;  %s616_s8 = scalar_lea.hbm %s795_s5, 1024 }
  0x23   :  { %s49_s28 = sshll.u32 %s646_s26, 4  ;;  %p617_p2 = scmp.ne.s32.totalorder %s795_s5, %s616_s8  ;;  %s50_s28 = int_to_ptr.vmem [resolvable:$true] %s49_s28 }
  0x24   :  { %p620_p3 = scmp.lt.u32.totalorder %s616_s8, %s795_s5 }
  0x26   :  { %p622_p4 = pnand %p620_p3, %p617_p2 }
  0x28   :  { %625 = shalt.err (!%p622_p4)
}
  0x29   :  { %s626_s15 = scalar_lea.vmem %s50_s28, 1024  ;;  %p631_p6 = scmp.lt.s32.totalorder %s50_s28, %s50_s28 }
  0x2a   :  { %p627_p5 = scmp.ne.s32.totalorder %s50_s28, %s626_s15  ;;  %p632_p7 = scmp.lt.s32.totalorder %s626_s15, %s626_s15 }
  0x2c   :  { %p633_p8 = por %p632_p7, %p631_p6 }
  0x2e   :  { %p634_p9 = pnand %p633_p8, %p627_p5 }
  0x30   :  { %637 = shalt.err (!%p634_p9)
}
  0x31   :  { %55 = dma.hbm_to_vmem [thread:$0]  %s795_s5, 1024, %s50_s28, [#allocation5], %s644_s13, %s644_s13, %s645_s14  }
  0x32   :  { %638 = dma.done.wait [#allocation3], 1024  }
  0x33   :  { %639 = vsyncadd [#allocation3], 4294966272 }
  0x34   :  { %640 = dma.done.wait [#allocation5], 2048  }
  0x35   :  { %641 = vsyncadd [#allocation5], 4294965248  ;;  %v647_v0 = vmov 0.0   ;;  %vm648_vm0 = vmmov 0   ;;  %v547_v1 = vld [vmem:[#allocation2] sm:$0xff]   ;;  %v548_v2 = vld [vmem:[#allocation2 + $0x8] sm:$0xff]  }
  0x36   :  { %479 = vmatprep.subr.bf16.mxu0 %v647_v0  ;;  %495 = vmatprep.mubr.msk.bf16.mxu0 %vm648_vm0, %v647_v0  ;;  %v549_v3 = vld [vmem:[#allocation2 + $0x10] sm:$0xff]   ;;  %v556_v4 = vld [vmem:[#allocation4] sm:$0xff]   ;;  %v550_v5 = vld [vmem:[#allocation2 + $0x18] sm:$0xff]   ;;  %v649_v32 = vmov 0  }
  0x37   :  { %499 = vmatprep.subr.bf16.mxu1 %v647_v0  ;;  %515 = vmatprep.mubr.msk.bf16.mxu1 %vm648_vm0, %v647_v0  ;;  %v557_v6 = vld [vmem:[#allocation4 + $0x8] sm:$0xff]   ;;  %v551_v7 = vld [vmem:[#allocation2 + $0x20] sm:$0xff]   ;;  %v558_v8 = vld [vmem:[#allocation4 + $0x10] sm:$0xff]  }
  0x38   :  { %480 = vmatpush3.bf16.msra.mxu0 %v547_v1  ;;  %500 = vmatpush3.bf16.msra.mxu1 %v556_v4  ;;  %v552_v9 = vld [vmem:[#allocation2 + $0x28] sm:$0xff]   ;;  %v559_v10 = vld [vmem:[#allocation4 + $0x18] sm:$0xff]   ;;  %v553_v11 = vld [vmem:[#allocation2 + $0x30] sm:$0xff]  }
  0x39   :  { %481 = vmatprep.subr.bf16.mxu0 %v647_v0  ;;  %501 = vmatprep.subr.bf16.mxu1 %v647_v0  ;;  %v560_v12 = vld [vmem:[#allocation4 + $0x20] sm:$0xff]   ;;  %v554_v13 = vld [vmem:[#allocation2 + $0x38] sm:$0xff]   ;;  %v561_v14 = vld [vmem:[#allocation4 + $0x28] sm:$0xff]  }
  0x3a   :  { %v555_v15 = vld [vmem:[%s790_s0] sm:$0xff]   ;;  %v562_v16 = vld [vmem:[#allocation4 + $0x30] sm:$0xff]   ;;  %v563_v17 = vld [vmem:[#allocation4 + $0x38] sm:$0xff]  }
  0x3b   :  { %v564_v18 = vld [vmem:[#allocation6] sm:$0xff]   ;;  %v565_v19 = vld [vmem:[#allocation6 + $0x8] sm:$0xff]   ;;  %v566_v20 = vld [vmem:[#allocation6 + $0x10] sm:$0xff]  }
  0x3c   :  { %482 = vmatpush3.bf16.msra.mxu0 %v548_v2  ;;  %502 = vmatpush3.bf16.msra.mxu1 %v557_v6  ;;  %v567_v21 = vld [vmem:[#allocation6 + $0x18] sm:$0xff]   ;;  %v568_v22 = vld [vmem:[#allocation6 + $0x20] sm:$0xff]   ;;  %v569_v23 = vld [vmem:[#allocation6 + $0x28] sm:$0xff]  }
  0x3d   :  { %483 = vmatprep.subr.bf16.mxu0 %v647_v0  ;;  %503 = vmatprep.subr.bf16.mxu1 %v647_v0  ;;  %v424_v24 = vld [vmem:[%s792_s2] ss:$0 sm:$0xff]  ;;  %v570_v34 = vld [vmem:[#allocation6 + $0x30] sm:$0xff]   ;;  %v571_v35 = vld [vmem:[#allocation6 + $0x38] sm:$0xff]  }
  0x3e   :  { %v434_v36 = vld [vmem:[%s794_s4] ss:$0 sm:$0xff] }
  0x3f   :  { %v443_v45 = vld [vmem:[%s796_s6] ss:$0 sm:$0xff] }
  0x40   :  { %484 = vmatpush3.bf16.msra.mxu0 %v549_v3  ;;  %504 = vmatpush3.bf16.msra.mxu1 %v558_v8 }
  0x41   :  { %485 = vmatprep.subr.bf16.mxu0 %v647_v0  ;;  %505 = vmatprep.subr.bf16.mxu1 %v647_v0 }
  0x44   :  { %486 = vmatpush3.bf16.msra.mxu0 %v550_v5  ;;  %506 = vmatpush3.bf16.msra.mxu1 %v559_v10 }
  0x45   :  { %487 = vmatprep.subr.bf16.mxu0 %v647_v0  ;;  %507 = vmatprep.subr.bf16.mxu1 %v647_v0 }
  0x48   :  { %488 = vmatpush3.bf16.msra.mxu0 %v551_v7  ;;  %508 = vmatpush3.bf16.msra.mxu1 %v560_v12 }
  0x49   :  { %489 = vmatprep.subr.bf16.mxu0 %v647_v0  ;;  %509 = vmatprep.subr.bf16.mxu1 %v647_v0 }
  0x4c   :  { %490 = vmatpush3.bf16.msra.mxu0 %v552_v9  ;;  %510 = vmatpush3.bf16.msra.mxu1 %v561_v14 }
  0x4d   :  { %491 = vmatprep.subr.bf16.mxu0 %v647_v0  ;;  %511 = vmatprep.subr.bf16.mxu1 %v647_v0 }
  0x50   :  { %492 = vmatpush3.bf16.msra.mxu0 %v553_v11  ;;  %512 = vmatpush3.bf16.msra.mxu1 %v562_v16 }
  0x51   :  { %493 = vmatprep.subr.bf16.mxu0 %v647_v0  ;;  %513 = vmatprep.subr.bf16.mxu1 %v647_v0 }
  0x54   :  { %494 = vmatpush3.bf16.msra.mxu0 %v554_v13  ;;  %514 = vmatpush3.bf16.msra.mxu1 %v563_v17 }
  0x55   :  { %519 = vmatprep.subr.bf16.mxu0 %v647_v0 }
  0x57   :  { %496 = vmatmul.mubr.bf16.vlgmr.msra.gmra.mrb[0].mxu0 %v555_v15 }
  0x58   :  { %535 = vmatprep.mubr.msk.bf16.mxu0 %vm648_vm0, %v647_v0  ;;  %520 = vmatpush3.bf16.msra.mxu0 %v564_v18 }
  0x59   :  { %521 = vmatprep.subr.bf16.mxu0 %v647_v0 }
  0x5c   :  { %522 = vmatpush3.bf16.msra.mxu0 %v565_v19 }
  0x5d   :  { %523 = vmatprep.subr.bf16.mxu0 %v647_v0 }
  0x60   :  { %524 = vmatpush3.bf16.msra.mxu0 %v566_v20 }
  0x61   :  { %525 = vmatprep.subr.bf16.mxu0 %v647_v0 }
  0x64   :  { %526 = vmatpush3.bf16.msra.mxu0 %v567_v21 }
  0x65   :  { %527 = vmatprep.subr.bf16.mxu0 %v647_v0 }
  0x68   :  { %528 = vmatpush3.bf16.msra.mxu0 %v568_v22 }
  0x69   :  { %529 = vmatprep.subr.bf16.mxu0 %v647_v0 }
  0x6c   :  { %530 = vmatpush3.bf16.msra.mxu0 %v569_v23 }
  0x6d   :  { %531 = vmatprep.subr.bf16.mxu0 %v647_v0 }
  0x70   :  { %532 = vmatpush3.bf16.msra.mxu0 %v570_v34 }
  0x71   :  { %533 = vmatprep.subr.bf16.mxu0 %v647_v0 }
  0x74   :  { %534 = vmatpush3.bf16.msra.mxu0 %v571_v35 }
 0x12a   :  { %v181_v25 = vpop.f32.mrb[0].mxu0 }
 0x12b   :  { %v497_v26 = vpop.f32.mrb[1].mxu0  ;;  %v182_v28 = vadd.f32 %v424_v24, %v181_v25 }
 0x12c   :  { %v184_v27 = vpop.f32.mrb[2].mxu0 }
 0x12d   :  { %v185_v29 = vadd.f32 %v424_v24, %v184_v27  ;;  %v498_v30 = vpop.f32.mrb[3].mxu0 }
 0x12f   :  { %v188_v31 = vpack.c.bf16 %v185_v29, %v182_v28 }
 0x131   :  { %v189_v33 = vmax.bf16 %v649_v32, %v188_v31 }
 0x133   :  { %516 = vmatmul.mubr.bf16.vlgmr.msra.gmra.mrb[0].mxu1 %v189_v33 }
 0x206   :  { %v295_v37 = vpop.f32.mrb[0].mxu1 }
 0x207   :  { %v517_v38 = vpop.f32.mrb[1].mxu1  ;;  %v296_v40 = vadd.f32 %v434_v36, %v295_v37 }
 0x208   :  { %v298_v39 = vpop.f32.mrb[2].mxu1 }
 0x209   :  { %v299_v41 = vadd.f32 %v434_v36, %v298_v39  ;;  %v518_v42 = vpop.f32.mrb[3].mxu1 }
 0x20b   :  { %v302_v43 = vpack.c.bf16 %v299_v41, %v296_v40 }
 0x20d   :  { %v303_v44 = vmax.bf16 %v649_v32, %v302_v43 }
 0x20f   :  { %536 = vmatmul.mubr.bf16.vlgmr.msra.gmra.mrb[4].mxu0 %v303_v44 }
 0x2e2   :  { %v409_v46 = vpop.f32.mrb[4].mxu0 }
 0x2e3   :  { %v410_v47 = vadd.f32 %v443_v45, %v409_v46  ;;  %v537_v48 = vpop.f32.mrb[5].mxu0 }
 0x2e4   :  { %v412_v49 = vpop.f32.mrb[6].mxu0 }
 0x2e5   :  { %416 = vst [vmem:[%s797_s7] sm:$0xff] %v410_v47  ;;  %v413_v50 = vadd.f32 %v443_v45, %v412_v49  ;;  %v538_v51 = vpop.f32.mrb[7].mxu0 }
 0x2e7   :  { %417 = vst [vmem:[%s797_s7 + $0x8] sm:$0xff] %v413_v50 }
 0x2e8   :  { %422 = vsyncpa [#allocation3], 1 }
 0x2e9   :  { %423 = vsyncpa [#allocation5], 1 }

</bundles_post_ra>
